<compile_context>
chip_gen: v5e
topology: v5e:2x2
jax: 0.10.0
libtpu: 0.0.40
codegen_flags: <defaults>
</compile_context>

<pallas_src>
import functools

import numpy as np
import jax
import jax.numpy as jnp
from jax import lax
from jax.experimental import pallas as pl
from jax.experimental.pallas import tpu as pltpu


# ----------------------------------------------------------------------------
# Pallas kernel
# ----------------------------------------------------------------------------
def _fused_sample_kernel(iparams_ref, l_ref, r_ref, x_ref, o_ref, *, noise_std):
    """One (channel, pipeline) grid step: out[p, c] = L[p] @ aug_p(x[c]) @ R[p]^T."""
    c = pl.program_id(0)            # channel (outer axis: x block reused across p)
    p = pl.program_id(1)            # pipeline index within the fused 2*bs batch
    _, S, H = l_ref.shape           # l_ref holds the full (P, S, H) stack (resident)
    W = r_ref.shape[1]              # r_ref holds the full (P, W, S) stack (resident)

    l_p = l_ref[p]                  # (S, H) f32, dynamic index into resident stack
    r_p = r_ref[p]                  # (W, S) f32 (R pre-transposed on host)

    def produce(xe):
        tmp = jnp.dot(l_p, xe, preferred_element_type=jnp.float32)    # (S, W)
        out = jnp.dot(tmp, r_p, preferred_element_type=jnp.float32)   # (S, S)
        o_ref[...] = out.reshape(1, 1, S, S)

    noise_on = iparams_ref[p, 4]
    cut = iparams_ref[p, 3]
    do_aug = (noise_on != 0) | (cut != 0)

    # ---- pipeline-1 steps: no noise / cutout -> skip ALL elementwise work ----
    @pl.when(jnp.logical_not(do_aug))
    def _():
        produce(x_ref[0])

    # ---- pipeline-2 steps: in-kernel noise + cutout, then the fused resample --
    @pl.when(do_aug)
    def _():
        rows = lax.broadcasted_iota(jnp.int32, (H, W), 0)
        cols = lax.broadcasted_iota(jnp.int32, (H, W), 1)

        # Single-draw counter-based hash noise (murmur-style mix on the VPU; no
        # pltpu PRNG, so it lowers on Mosaic AND in interpret mode).
        # uniform(-sqrt(3), sqrt(3)) -> zero mean, ~unit std.
        # TODO(synk): `transform.noise` source not given in the spec; gaussian-like
        # zero-mean unit-std noise is assumed and synthesized fully in-kernel.
        seed = iparams_ref[p, 0] + c * jnp.int32(1000003)   # int32 wrap is harmless
        h = rows * jnp.int32(W) + cols + seed
        h = h * jnp.int32(-1640531527)
        h = h ^ (h >> 16)
        h = h * jnp.int32(-2048144789)
        h = h ^ (h >> 13)
        h = h * jnp.int32(-1028477387)
        h = h ^ (h >> 16)
        nz = h.astype(jnp.float32) * jnp.float32(1.7320508 / 2147483648.0)
        scale = jnp.where(noise_on != 0, jnp.float32(noise_std), jnp.float32(0.0))
        xe = x_ref[0] + nz * scale

        # Cutout mask built from 3 SMEM scalars (cut == 0 -> mask is empty).
        # TODO(synk): `transform.cutout` source not given; random square cutout assumed.
        cy = iparams_ref[p, 1]
        cx = iparams_ref[p, 2]
        inside = ((rows >= cy) & (rows < cy + cut) &
                  (cols >= cx) & (cols < cx + cut))
        xe = jnp.where(inside, jnp.float32(0.0), xe)
        produce(xe)


@functools.partial(jax.jit, static_argnames=("noise_std",))
def _fused_sample(iparams, lmat, rtmat, x_chw, *, noise_std):
    """iparams: (P,5) i32 [seed, cy, cx, cut, noise_on]; lmat: (P,S,H) f32;
    rtmat: (P,W,S) f32; x_chw: (C,H,W) f32  ->  (P,C,S,S) f32."""
    P, S, H = lmat.shape
    C, _, W = x_chw.shape

    # VMEM budget: resident L/R stacks, double-buffered x / out blocks, plus the
    # noise / mask temporaries and the (S, W) matmul intermediate.
    est = (P * S * H + P * W * S          # resident L / R stacks
           + 2 * H * W + 2 * S * S        # double-buffered x and out blocks
           + 3 * H * W + S * W) * 4       # aug temporaries + intermediate
    vmem_limit = int(min(max(2 * est, 32 * 2**20), 40 * 2**20))
    # TODO(synk): for very large H*W (>~1k^2, tight on v7x's 64 MiB VMEM) add an
    # H-tiling grid axis with an (S, W) f32 accumulator (pl.when-init) instead.

    kernel = functools.partial(_fused_sample_kernel, noise_std=float(noise_std))
    return pl.pallas_call(
        kernel,
        out_shape=jax.ShapeDtypeStruct((P, C, S, S), jnp.float32),
        grid_spec=pltpu.PrefetchScalarGridSpec(
            num_scalar_prefetch=1,
            grid=(C, P),
            in_specs=[
                # L / R stacks: constant block index -> DMA'd once, resident for
                # the entire grid (no per-channel re-streaming).
                pl.BlockSpec((P, S, H), lambda c, p, ip: (0, 0, 0)),
                pl.BlockSpec((P, W, S), lambda c, p, ip: (0, 0, 0)),
                # x: indexed only by the outer channel axis -> fetched once per
                # channel and reused across all P inner pipeline steps.
                pl.BlockSpec((1, H, W), lambda c, p, ip: (c, 0, 0)),
            ],
            out_specs=pl.BlockSpec((1, 1, S, S), lambda c, p, ip: (p, c, 0, 0)),
        ),
        compiler_params=pltpu.CompilerParams(
            # Channel (outer) axis is the parallel one: shardable across v7x's
            # two TensorCores without duplicating x DMA; pipeline axis sequential.
            dimension_semantics=("parallel", "arbitrary"),
            vmem_limit_bytes=vmem_limit,
        ),
    )(iparams, lmat, rtmat, x_chw)


# ----------------------------------------------------------------------------
# Host-side glue: separable operator matrices (tiny numpy)
# ----------------------------------------------------------------------------
def bilinear_matrix(coords, in_size):
    """Rows of bilinear weights for F.grid_sample (align_corners=False, zeros)."""
    px = ((coords.astype(np.float64) + 1.0) * in_size - 1.0) / 2.0
    w0 = np.floor(px)
    frac = px - w0
    i0 = w0.astype(np.int64)
    i1 = i0 + 1
    idx = np.arange(in_size)
    W = ((i0[:, None] == idx[None, :]) * (1.0 - frac)[:, None]
         + (i1[:, None] == idx[None, :]) * frac[:, None])   # OOB never matches -> 0
    return W.astype(np.float32)


def area_matrix(out_size, in_size):
    """F.interpolate(mode='area') == adaptive avg pool (equal weights)."""
    A = np.zeros((out_size, in_size), np.float32)
    for i in range(out_size):
        s = (i * in_size) // out_size
        e = -((-(i + 1) * in_size) // out_size)
        A[i, s:e] = 1.0 / float(e - s)
    return A


def pool_matrix(in_size, k):
    """avg_pool (kernel=k, stride=k, no padding) as a matrix."""
    out = in_size // k
    P = np.zeros((out, in_size), np.float32)
    for i in range(out):
        P[i, i * k:(i + 1) * k] = 1.0 / float(k)
    return P


def grid_coords_1d(l, mode, rng):
    """1-D x / y coordinate vectors of random_generate_grid ('even'/'repeat')."""
    if mode == "even":
        coords = (np.arange(l, dtype=np.float64) / (l - 1.0) - 0.5) * 2.0
        offset = rng.random() * 0.6
        x_off = offset * (1.0 + 0.05 * (rng.random() * 2.0 - 1.0))
        y_off = offset * (1.0 + 0.05 * (rng.random() * 2.0 - 1.0))
        x = coords * (1.0 - x_off) + (rng.random() * 2.0 - 1.0) * x_off
        y = coords * (1.0 - y_off) + (rng.random() * 2.0 - 1.0) * y_off
    else:  # 'repeat'
        x = np.sort(rng.random(l))
        y = np.sort(rng.random(l))
        x = (x - x.min()) / max(float(x.max() - x.min()), 1e-8) * 2.0 - 1.0
        y = (y - y.min()) / max(float(y.max() - y.min()), 1e-8) * 2.0 - 1.0
    return x.astype(np.float32), y.astype(np.float32)


# ----------------------------------------------------------------------------
# Module equivalent
# ----------------------------------------------------------------------------
class ImgSampleStyleganPallas:
    def __init__(self, kernel_min=1, kernel_max=8, grid_size_min=224,
                 grid_size_max=448, noise=1.0, noise_std=0.3,
                 cutout=1.0, cutout_size=0.25, seed=0):
        self.kernel_min = kernel_min
        self.kernel_max = kernel_max
        self.grid_size_min = grid_size_min
        self.grid_size_max = grid_size_max
        self.noise = noise
        self.noise_std = noise_std
        self.cutout = cutout
        self.cutout_size = cutout_size
        self.seed = seed

    def __call__(self, x, size=224, bs=1):
        # x: (1, C, H, W) (grid_sample with a batch-1 grid => input batch is 1)
        _, C, H, W = x.shape
        x_chw = jnp.asarray(x[0], jnp.float32)
        rng = np.random.default_rng(self.seed)

        P = 2 * bs
        # Lane-pad the output rows/cols for unmasked stores at realistic sizes
        # (224 -> 256, 448 stays); tiny demo sizes are left untouched.
        S_pad = ((size + 127) // 128) * 128 if size >= 128 else size

        def pad_rows(M):          # (size, n) -> (S_pad, n), zero rows appended
            if S_pad == size:
                return M.astype(np.float32)
            out = np.zeros((S_pad, M.shape[1]), np.float32)
            out[:size] = M
            return out

        L_list, R_list = [], []
        iparams = np.zeros((P, 5), np.int32)      # [seed, cy, cx, cut, noise_on]

        for b in range(bs):
            upper = int(rng.integers(self.kernel_min + 1, self.kernel_max))
            kernel_size = int(rng.integers(self.kernel_min, upper))
            grid_mode = ("all", "even", "repeat")[int(rng.integers(1, 3))]
            Lg = int(self.grid_size_min
                     + rng.random() * (self.grid_size_max - self.grid_size_min))

            gx, gy = grid_coords_1d(Lg, grid_mode, rng)
            A = area_matrix(size, Lg)

            # ---- pipeline 1: grid_sample -> area interp (no noise / cutout) ----
            L1 = A @ bilinear_matrix(gy, H)                       # (size, H)
            R1 = A @ bilinear_matrix(gx, W)                       # (size, W)
            L_list.append(pad_rows(L1))
            R_list.append(pad_rows(R1).T)                         # (W, S_pad)

            # ---- pipeline 2: noise -> cutout -> avg_pool -> grid_sample -> area ----
            # TODO(synk): `transform.noise` / `transform.cutout` sources not provided;
            # implemented as hash noise + random square cutout (in-kernel).
            p2 = 2 * b + 1
            if rng.random() < self.noise:
                iparams[p2, 4] = 1                                # noise on
            iparams[p2, 0] = int(rng.integers(0, 2**30))          # noise seed
            cut = int(round(self.cutout_size * min(H, W)))
            if rng.random() < self.cutout and cut > 0:
                iparams[p2, 1] = int(rng.integers(0, H - cut + 1))
                iparams[p2, 2] = int(rng.integers(0, W - cut + 1))
                iparams[p2, 3] = cut

            Hp, Wp = H // kernel_size, W // kernel_size
            L2 = A @ bilinear_matrix(gy, Hp) @ pool_matrix(H, kernel_size)  # (size, H)
            R2 = A @ bilinear_matrix(gx, Wp) @ pool_matrix(W, kernel_size)  # (size, W)
            L_list.append(pad_rows(L2))
            R_list.append(pad_rows(R2).T)

        lmat = jnp.asarray(np.stack(L_list), dtype=jnp.float32)    # (P, S_pad, H)
        rtmat = jnp.asarray(np.stack(R_list), dtype=jnp.float32)   # (P, W, S_pad)

        out = _fused_sample(jnp.asarray(iparams), lmat, rtmat, x_chw,
                            noise_std=float(self.noise_std))
        if S_pad != size:
            out = out[:, :, :size, :size]
        return out   # (2*bs, C, size, size) — matches torch.cat(imgs, dim=0)


# ----------------------------------------------------------------------------
if __name__ == "__main__":
    key = jax.random.PRNGKey(0)
    x = jax.random.normal(key, (1, 4, 16, 16), jnp.float32)  # NCHW, batch must be 1

    module = ImgSampleStyleganPallas(
        kernel_min=1, kernel_max=4,
        grid_size_min=8, grid_size_max=12,
        noise=1.0, noise_std=0.3,
        cutout=1.0, cutout_size=0.25,
        seed=0,
    )

    out = module(x, size=8, bs=2)
    out = jax.block_until_ready(out)
    assert out.shape == (4, 4, 8, 8), out.shape
    assert bool(jnp.all(jnp.isfinite(out)))
    print("KERNEL_OK")
</pallas_src>

<mosaic_0001>
module attributes {stable_mosaic.version = 11 : i64} {
  func.func @_fused_sample_kernel(%arg0: i32, %arg1: i32, %arg2: memref<4x5xi32, #tpu.memory_space<smem>>, %arg3: memref<4x8x16xf32, #tpu.memory_space<vmem>>, %arg4: memref<4x16x8xf32, #tpu.memory_space<vmem>>, %arg5: memref<1x16x16xf32, #tpu.memory_space<vmem>>, %arg6: memref<1x1x8x8xf32, #tpu.memory_space<vmem>>) attributes {dimension_semantics = [#tpu.dimension_semantics<parallel>, #tpu.dimension_semantics<arbitrary>], iteration_bounds = array<i64: 4, 4>, scalar_prefetch = 1 : i64, scratch_operands = 0 : i64, tpu.core_type = #tpu.core_type<tc>, window_params = [{pipeline_mode = #tpu.pipeline_mode<synchronous>, transform_indices = @transform_0, window_bounds = array<i64: 4, 8, 16>}, {pipeline_mode = #tpu.pipeline_mode<synchronous>, transform_indices = @transform_1, window_bounds = array<i64: 4, 16, 8>}, {transform_indices = @transform_2, window_bounds = array<i64: 1, 16, 16>}, {transform_indices = @transform_3, window_bounds = array<i64: 1, 1, 8, 8>}]} {
    %0 = arith.index_cast %arg1 : i32 to index
    %c0 = arith.constant 0 : index
    %c0_0 = arith.constant 0 : index
    %1 = vector.load %arg3[%0, %c0, %c0_0] : memref<4x8x16xf32, #tpu.memory_space<vmem>>, vector<1x8x16xf32>
    %2 = vector.shape_cast %1 : vector<1x8x16xf32> to vector<8x16xf32>
    %3 = arith.index_cast %arg1 : i32 to index
    %c0_1 = arith.constant 0 : index
    %c0_2 = arith.constant 0 : index
    %4 = vector.load %arg4[%3, %c0_1, %c0_2] : memref<4x16x8xf32, #tpu.memory_space<vmem>>, vector<1x16x8xf32>
    %5 = vector.shape_cast %4 : vector<1x16x8xf32> to vector<16x8xf32>
    %6 = arith.index_cast %arg1 : i32 to index
    %c4 = arith.constant 4 : index
    %7 = memref.load %arg2[%6, %c4] : memref<4x5xi32, #tpu.memory_space<smem>>
    %8 = arith.index_cast %arg1 : i32 to index
    %c3 = arith.constant 3 : index
    %9 = memref.load %arg2[%8, %c3] : memref<4x5xi32, #tpu.memory_space<smem>>
    %c0_i32 = arith.constant 0 : i32
    %10 = arith.cmpi ne, %7, %c0_i32 : i32
    %c0_i32_3 = arith.constant 0 : i32
    %11 = arith.cmpi ne, %9, %c0_i32_3 : i32
    %12 = arith.ori %10, %11 : i1
    %true = arith.constant true
    %13 = arith.xori %12, %true : i1
    %14 = arith.extui %13 : i1 to i32
    %c0_i32_4 = arith.constant 0 : i32
    %15 = arith.cmpi ne, %14, %c0_i32_4 : i32
    scf.if %15 {
      %c0_6 = arith.constant 0 : index
      %c0_7 = arith.constant 0 : index
      %c0_8 = arith.constant 0 : index
      %18 = vector.load %arg5[%c0_6, %c0_7, %c0_8] : memref<1x16x16xf32, #tpu.memory_space<vmem>>, vector<1x16x16xf32>
      %19 = vector.shape_cast %18 : vector<1x16x16xf32> to vector<16x16xf32>
      %cst = arith.constant dense<0.000000e+00> : vector<8x16xf32>
      %20 = tpu.matmul %2, %19, %cst {dimension_numbers = #tpu.dot_dimension_numbers<[1], [0], [0], [1], [0, 0, 1, 1], [], []>} : vector<8x16xf32>, vector<16x16xf32>, vector<8x16xf32> -> vector<8x16xf32>
      %cst_9 = arith.constant dense<0.000000e+00> : vector<8x8xf32>
      %21 = tpu.matmul %20, %5, %cst_9 {dimension_numbers = #tpu.dot_dimension_numbers<[1], [0], [0], [1], [0, 0, 1, 1], [], []>} : vector<8x16xf32>, vector<16x8xf32>, vector<8x8xf32> -> vector<8x8xf32>
      %22 = vector.shape_cast %21 : vector<8x8xf32> to vector<1x1x8x8xf32>
      %c0_10 = arith.constant 0 : index
      %c0_11 = arith.constant 0 : index
      %c0_12 = arith.constant 0 : index
      %c0_13 = arith.constant 0 : index
      %23 = vector.load %arg6[%c0_10, %c0_11, %c0_12, %c0_13] : memref<1x1x8x8xf32, #tpu.memory_space<vmem>>, vector<1x1x8x8xf32>
      tpu.vector_store %arg6[%c0_10, %c0_11, %c0_12, %c0_13], %22 {strides = array<i32>} : memref<1x1x8x8xf32, #tpu.memory_space<vmem>>, vector<1x1x8x8xf32>,
    } else {
    }
    %16 = arith.extui %12 : i1 to i32
    %c0_i32_5 = arith.constant 0 : i32
    %17 = arith.cmpi ne, %16, %c0_i32_5 : i32
    scf.if %17 {
      %18 = tpu.iota {dimensions = array<i32: 0>} : vector<16x16xi32>
      %19 = tpu.iota {dimensions = array<i32: 1>} : vector<16x16xi32>
      %20 = arith.index_cast %arg1 : i32 to index
      %c0_6 = arith.constant 0 : index
      %21 = memref.load %arg2[%20, %c0_6] : memref<4x5xi32, #tpu.memory_space<smem>>
      %c1000003_i32 = arith.constant 1000003 : i32
      %22 = arith.muli %arg0, %c1000003_i32 : i32
      %23 = arith.addi %21, %22 : i32
      %c16_i32 = arith.constant 16 : i32
      %24 = vector.broadcast %c16_i32 : i32 to vector<16x16xi32>
      %25 = arith.muli %18, %24 : vector<16x16xi32>
      %26 = arith.addi %25, %19 : vector<16x16xi32>
      %27 = vector.broadcast %23 : i32 to vector<16x16xi32>
      %28 = arith.addi %26, %27 : vector<16x16xi32>
      %c-1640531527_i32 = arith.constant -1640531527 : i32
      %29 = vector.broadcast %c-1640531527_i32 : i32 to vector<16x16xi32>
      %30 = arith.muli %28, %29 : vector<16x16xi32>
      %c16_i32_7 = arith.constant 16 : i32
      %31 = vector.broadcast %c16_i32_7 : i32 to vector<16x16xi32>
      %32 = arith.shrsi %30, %31 : vector<16x16xi32>
      %33 = arith.xori %30, %32 : vector<16x16xi32>
      %c-2048144789_i32 = arith.constant -2048144789 : i32
      %34 = vector.broadcast %c-2048144789_i32 : i32 to vector<16x16xi32>
      %35 = arith.muli %33, %34 : vector<16x16xi32>
      %c13_i32 = arith.constant 13 : i32
      %36 = vector.broadcast %c13_i32 : i32 to vector<16x16xi32>
      %37 = arith.shrsi %35, %36 : vector<16x16xi32>
      %38 = arith.xori %35, %37 : vector<16x16xi32>
      %c-1028477387_i32 = arith.constant -1028477387 : i32
      %39 = vector.broadcast %c-1028477387_i32 : i32 to vector<16x16xi32>
      %40 = arith.muli %38, %39 : vector<16x16xi32>
      %c16_i32_8 = arith.constant 16 : i32
      %41 = vector.broadcast %c16_i32_8 : i32 to vector<16x16xi32>
      %42 = arith.shrsi %40, %41 : vector<16x16xi32>
      %43 = arith.xori %40, %42 : vector<16x16xi32>
      %44 = arith.sitofp %43 : vector<16x16xi32> to vector<16x16xf32>
      %cst = arith.constant 8.06548994E-10 : f32
      %45 = vector.broadcast %cst : f32 to vector<16x16xf32>
      %46 = arith.mulf %44, %45 : vector<16x16xf32>
      %c0_i32_9 = arith.constant 0 : i32
      %47 = arith.cmpi ne, %7, %c0_i32_9 : i32
      %cst_10 = arith.constant 3.000000e-01 : f32
      %cst_11 = arith.constant 0.000000e+00 : f32
      %48 = arith.select %47, %cst_10, %cst_11 : f32
      %c0_12 = arith.constant 0 : index
      %c0_13 = arith.constant 0 : index
      %c0_14 = arith.constant 0 : index
      %49 = vector.load %arg5[%c0_12, %c0_13, %c0_14] : memref<1x16x16xf32, #tpu.memory_space<vmem>>, vector<1x16x16xf32>
      %50 = vector.shape_cast %49 : vector<1x16x16xf32> to vector<16x16xf32>
      %51 = vector.broadcast %48 : f32 to vector<16x16xf32>
      %52 = arith.mulf %46, %51 : vector<16x16xf32>
      %53 = arith.addf %50, %52 : vector<16x16xf32>
      %54 = arith.index_cast %arg1 : i32 to index
      %c1 = arith.constant 1 : index
      %55 = memref.load %arg2[%54, %c1] : memref<4x5xi32, #tpu.memory_space<smem>>
      %56 = arith.index_cast %arg1 : i32 to index
      %c2 = arith.constant 2 : index
      %57 = memref.load %arg2[%56, %c2] : memref<4x5xi32, #tpu.memory_space<smem>>
      %58 = vector.broadcast %55 : i32 to vector<16x16xi32>
      %59 = arith.cmpi sge, %18, %58 : vector<16x16xi32>
      %60 = arith.addi %55, %9 : i32
      %61 = vector.broadcast %60 : i32 to vector<16x16xi32>
      %62 = arith.cmpi slt, %18, %61 : vector<16x16xi32>
      %63 = arith.andi %59, %62 : vector<16x16xi1>
      %64 = vector.broadcast %57 : i32 to vector<16x16xi32>
      %65 = arith.cmpi sge, %19, %64 : vector<16x16xi32>
      %66 = arith.andi %63, %65 : vector<16x16xi1>
      %67 = arith.addi %57, %9 : i32
      %68 = vector.broadcast %67 : i32 to vector<16x16xi32>
      %69 = arith.cmpi slt, %19, %68 : vector<16x16xi32>
      %70 = arith.andi %66, %69 : vector<16x16xi1>
      %cst_15 = arith.constant 0.000000e+00 : f32
      %71 = vector.broadcast %cst_15 : f32 to vector<16x16xf32>
      %72 = arith.select %70, %71, %53 : vector<16x16xi1>, vector<16x16xf32>
      %cst_16 = arith.constant dense<0.000000e+00> : vector<8x16xf32>
      %73 = tpu.matmul %2, %72, %cst_16 {dimension_numbers = #tpu.dot_dimension_numbers<[1], [0], [0], [1], [0, 0, 1, 1], [], []>} : vector<8x16xf32>, vector<16x16xf32>, vector<8x16xf32> -> vector<8x16xf32>
      %cst_17 = arith.constant dense<0.000000e+00> : vector<8x8xf32>
      %74 = tpu.matmul %73, %5, %cst_17 {dimension_numbers = #tpu.dot_dimension_numbers<[1], [0], [0], [1], [0, 0, 1, 1], [], []>} : vector<8x16xf32>, vector<16x8xf32>, vector<8x8xf32> -> vector<8x8xf32>
      %75 = vector.shape_cast %74 : vector<8x8xf32> to vector<1x1x8x8xf32>
      %c0_18 = arith.constant 0 : index
      %c0_19 = arith.constant 0 : index
      %c0_20 = arith.constant 0 : index
      %c0_21 = arith.constant 0 : index
      %76 = vector.load %arg6[%c0_18, %c0_19, %c0_20, %c0_21] : memref<1x1x8x8xf32, #tpu.memory_space<vmem>>, vector<1x1x8x8xf32>
      tpu.vector_store %arg6[%c0_18, %c0_19, %c0_20, %c0_21], %75 {strides = array<i32>} : memref<1x1x8x8xf32, #tpu.memory_space<vmem>>, vector<1x1x8x8xf32>,
    } else {
    }
    return
  }
  func.func @transform_0(%arg0: i32, %arg1: i32, %arg2: memref<4x5xi32, #tpu.memory_space<smem>>) -> (i32, i32, i32) {
    %c0_i32 = arith.constant 0 : i32
    %c0_i32_0 = arith.constant 0 : i32
    %c0_i32_1 = arith.constant 0 : i32
    %c0_i32_2 = arith.constant 0 : i32
    return %c0_i32, %c0_i32_0, %c0_i32_1 : i32, i32, i32
  }
  func.func @transform_1(%arg0: i32, %arg1: i32, %arg2: memref<4x5xi32, #tpu.memory_space<smem>>) -> (i32, i32, i32) {
    %c0_i32 = arith.constant 0 : i32
    %c0_i32_0 = arith.constant 0 : i32
    %c0_i32_1 = arith.constant 0 : i32
    %c0_i32_2 = arith.constant 0 : i32
    return %c0_i32, %c0_i32_0, %c0_i32_1 : i32, i32, i32
  }
  func.func @transform_2(%arg0: i32, %arg1: i32, %arg2: memref<4x5xi32, #tpu.memory_space<smem>>) -> (i32, i32, i32) {
    %c0_i32 = arith.constant 0 : i32
    %c0_i32_0 = arith.constant 0 : i32
    %c0_i32_1 = arith.constant 0 : i32
    return %arg0, %c0_i32, %c0_i32_0 : i32, i32, i32
  }
  func.func @transform_3(%arg0: i32, %arg1: i32, %arg2: memref<4x5xi32, #tpu.memory_space<smem>>) -> (i32, i32, i32, i32) {
    %c0_i32 = arith.constant 0 : i32
    %c0_i32_0 = arith.constant 0 : i32
    %c0_i32_1 = arith.constant 0 : i32
    return %arg1, %arg0, %c0_i32, %c0_i32_0 : i32, i32, i32, i32
  }
}

</mosaic_0001>

<bundles_post_ra>
// kernel: _fused_sample.1
= control target key start
LH: loop header
LB: loop body
LE: loop exit
PB: predicated region body
PF: predicated region fallthrough
CT: control target
= control target key end

     0   :  { %s683_s18 = smov [#allocation3]   ;;  %s910_s0 = inlined_call_operand.hbm [shape: s32[4,5], index: 0, kind: input, shape index: {}]   ;;  %s911_s1 = inlined_call_operand.vmem [shape: f32[4,8,16], index: 1, kind: input, shape index: {}]   ;;  %s912_s2 = inlined_call_operand.vmem [shape: f32[4,16,8], index: 2, kind: input, shape index: {}]   ;;  %s913_s3 = inlined_call_operand.vmem [shape: f32[4,16,16], index: 3, kind: input, shape index: {}]   ;;  %s914_s4 = inlined_call_operand.hbm [shape: f32[4,4,8,8], index: 4, kind: output, shape index: {}]  }
   0x1   :  { %s10_s17 = sshll.u32 %s910_s0, 4  ;;  %s11_s17 = int_to_ptr.hbm [resolvable:$true] %s10_s17 }
   0x2   :  { %13 = dma.hbm_to_smem %s11_s17, 64, %s683_s18, [#allocation2] }
   0x3   :  { %645 = dma.done.wait [#allocation2], 64 }
   0x4   :  { %646 = vsyncadd [#allocation2], 4294967232 }
   0x5   :  { %16 = sfence }
   0x6   :  { %17 = vsyncpa [#allocation5], 0 }
   0x7   :  { %19 = vsyncpa [#allocation5 + $0x1], 0  ;;  %s712_s19 = smov 0   ;;  %s714_s20 = smov 0  }
   0x8   :  { %s716_s21 = smov 0   ;;  %s718_s22 = smov 0  }
   0x9   :  { %s720_s23 = smov 0   ;;  %s722_s24 = smov 0  }
   0xa   :  { %s724_s0 = smov 0   ;;  %s726_s25 = smov 0  }
   0xb LB: > { %s476_s26 = sadd.s32 4294967295, %s681_s25   ;;  %s477_s27 = sadd.s32 4294967294, %s681_s25   ;;  %s681_s25 = sphi %s726_s25, %s25_s25   ;;  %s677_s0 = sphi %s724_s0, %s933_s0   ;;  %s673_s24 = sphi %s722_s24, %s932_s24   ;;  %s669_s23 = sphi %s720_s23, %s931_s23   ;;  %s665_s22 = sphi %s718_s22, %s930_s22   ;;  %s661_s21 = sphi %s716_s21, %s929_s21   ;;  %s657_s20 = sphi %s714_s20, %s928_s20   ;;  %s653_s19 = sphi %s712_s19, %s927_s19  }
   0xc   : > { %s34_s28 = sadd.s32 1, %s673_s24  ;;  %s37_s29 = sadd.s32 1, %s677_s0 }
   0xd   : > { %p35_p0 = scmp.ge.s32.totalorder %s34_s28, 4  ;;  %p124_p1 = scmp.ne.s32.totalorder %s661_s21, %s657_s20 }
   0xe   : > { %p125_p2 = scmp.eq.s32.totalorder %s476_s26, 15  ;;  %p130_p5 = scmp.ne.s32.totalorder %s657_s20, %s653_s19 }
   0xf   : > { %s935_s28 = smov (%p35_p0, %s34_s28), 0  ;;  %s937_s29 = smov (!%p35_p0, %s37_s29), %s677_s0 }
  0x10   : > { %s109_s30 = ssub.s32 %s673_s24, %s935_s28  ;;  %p763_p3 = por %p125_p2, %p124_p1 }
  0x11   : > { %p39_p4 = scmp.ge.s32.totalorder %s937_s29, 4  ;;  %p131_p6 = scmp.eq.s32.totalorder %s477_s27, 15 }
  0x12   : > { %p480_p7 = scmp.ge.s32.totalorder %s681_s25, 1  ;;  %p163_p9 = scmp.lt.s32.totalorder %s681_s25, 17 }
  0x13   : > { %s939_s29 = smov (%p39_p4, %s937_s29), 0  ;;  %p772_p8 = por %p131_p6, %p130_p5 }
  0x14   : > { %918 = sst [smem:[#allocation8_spill]] %s939_s29  ;;  %s110_s7 = ssub.s32 %s677_s0, %s939_s29 }
  0x15   : > { %s114_s8 = sadd.s32 1, %s661_s21  ;;  %s111_s9 = sor.u32 %s110_s7, %s109_s30 }
  0x16   : > { %p164_p10 = pnand %p480_p7, %p163_p9  ;;  %p112_p11 = scmp.eq.s32.totalorder %s111_s9, 0 }
  0x17   : > { %s915_s11 = sand.u32 (!%p164_p10), 1, %s657_s20   ;;  %p187_p12 = scmp.lt.s32.totalorder (!%p164_p10), %s669_s23, 3 }
  0x18   : > { %s781_s10 = scalar_select %p112_p11, %s661_s21, %s114_s8  }
  0x19   : > { %167 = sbr.rel (%p164_p10) target bundleno = 613 (0x265), region = 32  ;;  %s481_s12 = sshll.u32 (!%p164_p10), %s915_s11, 3 }
  0x1a   : > { %s484_s13 = sshll.u32 (!%p164_p10), %s665_s22, 3  ;;  %s485_s18 = sshll.u32 (!%p164_p10), %s665_s22, 4 }
  0x1b   : > { %s193_s16 = scalar_lea.vmem (!%p164_p10), %s911_s1, %s484_s13  ;;  %s796_s26 = sshll.u32 (!%p164_p10), %s665_s22, 7 }
  0x1c   : > { %s196_s8 = scalar_lea.vmem (!%p164_p10), %s912_s2, %s485_s18  ;;  %s200_s13 = sadd.s32 (!%p164_p10), 4, %s796_s26 }
  0x1d   : > { %s811_s14 = sld [smem:[#allocation3 + %s200_s13]] (!%p164_p10)  ;;  %s202_s15 = sadd.s32 (!%p164_p10), 3, %s796_s26 }
  0x1e   : > { %s188_s17 = scalar_select %p187_p12, %s669_s23, 3  ;;  %v792_v0 = vld [vmem:[%s193_s16] sm:$0xff]  ;;  %v808_v2 = vld [vmem:[%s196_s8 + $0x8] sm:$0xff] }
  0x1f   : > { %v806_v1 = vld [vmem:[%s196_s8] sm:$0xff]  ;;  %s814_s16 = sld [smem:[#allocation3 + %s202_s15]] }
  0x20   : > { %s500_s27 = sshll.u32 %s188_s17, 4  ;;  %s824_s17 = scalar_lea.vmem [#allocation4], %s481_s12 }
  0x21   : > { %s804_s29 = scalar_lea.vmem %s913_s3, %s500_s27 }
  0x23   : > { %p204_p13 = scmp.ne.s32.totalorder %s811_s14, 0 }
  0x25   : > { %p205_p0 = scmp.ne.s32.totalorder %s814_s16, 0 }
  0x27   : > { %p820_p1 = por %p205_p0, %p204_p13 }
  0x28   : > { %v210_v3 = vlaneseq (%p820_p1)  ;;  %s215_s18 = sld [smem:[#allocation3 + %s796_s26]] (%p820_p1)  ;;  %320 = vmatpush.msra.mxu1 (%p820_p1), %v808_v2  ;;  %s216_s27 = smul.u32 (%p820_p1), 1000003, %s669_s23  ;;  %v249_v44 = vld [vmem:[%s804_s29 + $0x8] sm:$0xff] (%p820_p1)  ;;  %v248_v45 = vld [vmem:[%s804_s29] sm:$0xff] (%p820_p1)  ;;  %vm279_vm14 = vcmask (%p820_p1), 130048   ;;  %vm326_vm15 = vcmask (%p820_p1), 64512  }
  0x29   : > { %209 = sbr.rel (!%p820_p1) target bundleno = 334 (0x14e), region = 36  ;;  %s255_s30 = sadd.s32 (%p820_p1), 1, %s796_s26 }
  0x2a   : > { %v211_v4 = vshrl.u32 (%p820_p1), %v210_v3, 7  ;;  %321 = vmatpush.msra.mxu1 (%p820_p1), %v806_v1  ;;  %v214_v6 = vand.u32 (%p820_p1), 127, %v210_v3  ;;  %s256_s7 = sld [smem:[#allocation3 + %s255_s30]] (%p820_p1)  ;;  %s257_s8 = sadd.s32 (%p820_p1), 2, %s796_s26 }
  0x2b   : > { %s258_s9 = sld [smem:[#allocation3 + %s257_s8]] (%p820_p1) }
  0x2c   : > { %v212_v5 = vadd.s32 (%p820_p1), 8, %v211_v4  ;;  %v218_v7 = vmul.u32 (%p820_p1), 16, %v211_v4 }
  0x2e   : > { %s217_s12 = sadd.s32 %s216_s27, %s215_s18  ;;  %v219_v8 = vmul.u32 16, %v212_v5  ;;  %v220_v9 = vadd.s32 %v218_v7, %v214_v6 }
  0x2f   : > { %v222_v10 = vstv %s217_s12  ;;  %s247_s15 = scalar_select %p204_p13, 0.3, 0.0 }
  0x30   : > { %v221_v11 = vadd.s32 %v219_v8, %v214_v6  ;;  %v223_v12 = vadd.s32 %v222_v10, %v220_v9  ;;  %s262_s13 = sadd.s32 %s256_s7, %s814_s16  ;;  %v259_v25 = vstv %s256_s7 }
  0x31   : > { %v263_v26 = vstv %s262_s13  ;;  %vm261_vm0 = vcmp.ge.s32.totalorder %v212_v5, %v259_v25  ;;  %v268_v29 = vstv %s258_s9  ;;  %s272_s26 = sadd.s32 %s258_s9, %s814_s16  ;;  %vm260_vm2 = vcmp.ge.s32.totalorder %v211_v4, %v259_v25 }
  0x32   : > { %v224_v13 = vadd.s32 %v222_v10, %v221_v11  ;;  %v225_v14 = vmul.u32 2654435769, %v223_v12  ;;  %vm265_vm1 = vcmp.lt.s32.totalorder %v212_v5, %v263_v26  ;;  %vm264_vm3 = vcmp.lt.s32.totalorder %v211_v4, %v263_v26 }
  0x33   : > { %vm836_vm4 = vmand %vm261_vm0, %vm265_vm1  ;;  %vm840_vm5 = vcmp.ge.s32.totalorder %v214_v6, %v268_v29  ;;  %v273_v36 = vstv %s272_s26  ;;  %v250_v41 = vstv %s247_s15 }
  0x34   : > { %v226_v15 = vmul.u32 2654435769, %v224_v13  ;;  %v227_v16 = vshra.s32 %v225_v14, 16  ;;  %vm266_vm6 = vmand %vm260_vm2, %vm264_vm3  ;;  %vm274_vm8 = vcmp.lt.s32.totalorder %v214_v6, %v273_v36 }
  0x35   : > { %vm271_vm7 = vmand %vm836_vm4, %vm840_vm5 }
  0x36   : > { %v228_v17 = vshra.s32 %v226_v15, 16  ;;  %v229_v18 = vxor.u32 %v227_v16, %v225_v14  ;;  %vm270_vm9 = vmand %vm266_vm6, %vm840_vm5 }
  0x37   : > { %vm276_vm10 = vmand %vm271_vm7, %vm274_vm8 }
  0x38   : > { %v230_v19 = vxor.u32 %v228_v17, %v226_v15  ;;  %v231_v20 = vmul.u32 2246822507, %v229_v18  ;;  %vm275_vm11 = vmand %vm270_vm9, %vm274_vm8 }
  0x39   : > { %vm487_vm12 = vmneg %vm276_vm10 }
  0x3a   : > { %v232_v21 = vmul.u32 2246822507, %v230_v19  ;;  %v233_v22 = vshra.s32 %v231_v20, 13  ;;  %vm489_vm13 = vmneg %vm275_vm11 }
  0x3c   : > { %v234_v23 = vshra.s32 %v232_v21, 13  ;;  %v235_v24 = vxor.u32 %v233_v22, %v231_v20 }
  0x3e   : > { %v236_v27 = vxor.u32 %v234_v23, %v232_v21  ;;  %v237_v28 = vmul.u32 3266489909, %v235_v24 }
  0x40   : > { %v238_v30 = vmul.u32 3266489909, %v236_v27  ;;  %v239_v31 = vshra.s32 %v237_v28, 16 }
  0x42   : > { %v240_v32 = vshra.s32 %v238_v30, 16  ;;  %v241_v33 = vxor.u32 %v239_v31, %v237_v28 }
  0x44   : > { %v242_v37 = vxor.u32 %v240_v32, %v238_v30  ;;  %v243_v38 = vcvt.s32.f32 %v241_v33 }
  0x46   : > { %v244_v39 = vcvt.s32.f32 %v242_v37  ;;  %v245_v40 = vmul.f32 8.06549e-10, %v243_v38 }
  0x48   : > { %v246_v42 = vmul.f32 8.06549e-10, %v244_v39  ;;  %v251_v43 = vmul.f32 %v250_v41, %v245_v40 }
  0x4a   : > { %v252_v46 = vmul.f32 %v250_v41, %v246_v42  ;;  %v253_v48 = vadd.f32 %v251_v43, %v248_v45 }
  0x4c   : > { %v254_v47 = vadd.f32 %v252_v46, %v249_v44 }
  0x4e   : > { %488 = vmatpush.msk.msra.mxu0 %vm487_vm12, %v254_v47 }
  0x50   : > { %490 = vmatpush.msk.msra.mxu0 %vm489_vm13, %v253_v48 }
  0x51   : > { %491 = vmatmul.msk.f32.vlgmr.msra.gmra.mxu0 %vm279_vm14, %v792_v0 }
  0xce   : > { %v300_v49 = vpop.f32.mrf.mxu0 }
  0xcf   : > { %492 = vmatmul.msk.f32.vlgmr.msra.gmra.mxu1 %vm279_vm14, %v300_v49 }
 0x14c   : > { %v323_v50 = vpop.f32.mrf.mxu1 }
 0x14d   : > { %327 = vst.msk [vmem:[%s824_s17] sm:$0xff] %vm326_vm15, %v323_v50 }
 0x14e PF: > { %330 = sbr.rel (%p820_p1) target bundleno = 596 (0x254), region = 40 }
 0x153   : > { %v332_v51 = vld [vmem:[%s804_s29 + $0x8] sm:$0xff]  ;;  %v331_v52 = vld [vmem:[%s804_s29] sm:$0xff]  ;;  %374 = vmatpush.msra.mxu1 %v808_v2  ;;  %vm333_vm0 = vcmask 130048   ;;  %vm380_vm1 = vcmask 64512  }
 0x154   : > { %351 = vmatpush.msra.mxu0 %v332_v51 }
 0x155   : > { %375 = vmatpush.msra.mxu1 %v806_v1 }
 0x156   : > { %352 = vmatpush.msra.mxu0 %v331_v52 }
 0x157   : > { %493 = vmatmul.msk.f32.vlgmr.msra.gmra.mxu0 %vm333_vm0, %v792_v0 }
 0x1d4   : > { %v354_v53 = vpop.f32.mrf.mxu0 }
 0x1d5   : > { %494 = vmatmul.msk.f32.vlgmr.msra.gmra.mxu1 %vm333_vm0, %v354_v53 }
 0x252   : > { %v377_v54 = vpop.f32.mrf.mxu1 }
 0x253   : > { %381 = vst.msk [vmem:[%s824_s17] sm:$0xff] %vm380_vm1, %v377_v54 }
 0x254 PF: > { %s496_s29 = sshll.u32 %s665_s22, 2  ;;  %s397_s16 = sshll.u32 %s824_s17, 4  ;;  %s398_s16 = int_to_ptr.vmem [resolvable:$true] %s397_s16 }
 0x255   : > { %s393_s14 = sadd.s32 %s669_s23, %s496_s29  ;;  %s925_s7 = sand.u32 1, %s657_s20  }
 0x256   : > { %s497_s11 = sshll.u32 %s393_s14, 3  ;;  %s383_s8 = scalar_lea.sflag [#allocation5], %s925_s7 }
 0x257   : > { %s395_s12 = scalar_lea.hbm %s914_s4, %s497_s11  ;;  %s605_s17 = scalar_lea.hbm %s914_s4, 128 }
 0x258   : > { %s399_s30 = sshll.u32 %s395_s12, 4  ;;  %s400_s30 = int_to_ptr.hbm [resolvable:$true] %s399_s30 }
 0x259   : > { %s599_s9 = sshra.s32 %s400_s30, 4  ;;  %s600_s9 = int_to_ptr.hbm [resolvable:$true] %s599_s9 }
 0x25a   : > { %s601_s13 = scalar_lea.hbm %s600_s9, 8  ;;  %p606_p6 = scmp.lt.s32.totalorder %s600_s9, %s914_s4 }
 0x25b   : > { %p602_p2 = scmp.ne.s32.totalorder %s600_s9, %s601_s13  ;;  %p607_p7 = scmp.lt.s32.totalorder %s605_s17, %s601_s13 }
 0x25d   : > { %p603_p4 = pnand %p602_p2, %p763_p3  ;;  %p608_p9 = por %p607_p7, %p606_p6 }
 0x25f   : > { %p604_p5 = pneg %p603_p4 }
 0x261   : > { %p609_p10 = pnand %p608_p9, %p604_p5 }
 0x263   : > { %612 = shalt.err (!%p609_p10)
}
 0x264   : > { %501 = dma.vmem_to_hbm [thread:$0]  (%p763_p3), %s398_s16, 128, %s400_s30, %s383_s8  }
 0x265 PF: > { %p507_p11 = scmp.ge.s32.totalorder %s681_s25, 2  ;;  %s411_s29 = sand.u32 1, %s653_s19  }
 0x266   : > { %s412_s14 = scalar_lea.sflag [#allocation5], %s411_s29 }
 0x267   : > { %p504_p12 = pnand %p507_p11, %p772_p8 }
 0x269   : > { %p505_p13 = pneg %p504_p12 }
 0x26b   : > { %648 = dma.done.wait (%p505_p13), %s412_s14, 128  }
 0x26c   : > { %650 = vsyncadd (%p505_p13), %s412_s14, 4294967168  ;;  %s25_s25 = sadd.s32 1, %s681_s25   ;;  %s926_s5 = sld [smem:[#allocation8_spill]] }
 0x26d   : > { %p22_p0 = scmp.ge.s32.totalorder %s25_s25, 18   ;;  %s927_s19 = smov %s657_s20 }
 0x26e   : > { %s928_s20 = smov %s661_s21  ;;  %s929_s21 = smov %s781_s10 }
 0x26f   : > { %s930_s22 = smov %s673_s24  ;;  %s931_s23 = smov %s677_s0 }
 0x270   : > { %s932_s24 = smov %s935_s28  ;;  %24 = sbr.rel (!%p22_p0) target bundleno = 11 (0xb), region = 77 }
 0x272   : > { %s933_s0 = smov %s926_s5 }
 0x275   :  { %418 = vsyncpa [#allocation5], 1 }
 0x276   :  { %420 = vsyncpa [#allocation5 + $0x1], 1 }

</bundles_post_ra>
